<compile_context>
chip_gen: v7x
topology: tpu7x:2x2x1
jax: 0.10.0
libtpu: 0.0.40
codegen_flags: <defaults>
</compile_context>

<pallas_src>
import jax
import jax.numpy as jnp
from jax.experimental import pallas as pl
from jax.experimental.pallas import tpu as pltpu

HIDDEN = 64  # fc1 / fc2 / action_encoder width, fixed by the module.


def _round_up(x, m):
    return ((x + m - 1) // m) * m


# ----------------------------------------------------------------------------
# Kernel: three MXU dots, no concat, no activation on fc1/action branches.
# ----------------------------------------------------------------------------
def qvalue_kernel(state_ref, action_ref,
                  w12_ref, b12_ref,
                  wot_ref, wao_ref, bo_ref,
                  out_ref):
    # Read biases once (broadcast hygiene).
    b12 = b12_ref[...]      # (1, 64)      f32
    bo = bo_ref[...]        # (1, A)       f32

    # Fused fc1+fc2 (+ReLU):  relu(state @ (W1@W2) + (b1@W2 + b2))
    x2 = jnp.maximum(
        jnp.dot(state_ref[...], w12_ref[...],
                preferred_element_type=jnp.float32) + b12,
        0.0)
    # Match weight dtype for the second dot (no-op in the f32 path, keeps the
    # bf16 path fully bf16 on the MXU inputs).
    x2 = x2.astype(wot_ref.dtype)

    # Split final matmul (no concat): x2 @ Wo_top + action @ (Wa@Wo_bot) + bo'
    out = jnp.dot(x2, wot_ref[...], preferred_element_type=jnp.float32)
    out = out + jnp.dot(action_ref[...], wao_ref[...],
                        preferred_element_type=jnp.float32)
    out_ref[...] = (out + bo).astype(out_ref.dtype)


# ----------------------------------------------------------------------------
# Host-side exact weight folding (done once, at init).
# ----------------------------------------------------------------------------
def fold_params(params, *, weight_dtype=jnp.float32):
    (w1, b1, w2, b2, wa, ba, wo, bo) = params
    w12 = (w1 @ w2).astype(weight_dtype)                 # (state_dim, 64)
    b12 = (b1 @ w2 + b2).astype(jnp.float32)             # (1, 64)
    wo_top = wo[:HIDDEN].astype(weight_dtype)            # (64, num_actions)
    wo_bot = wo[HIDDEN:]                                 # (64, num_actions)
    wao = (wa @ wo_bot).astype(weight_dtype)             # (action_dim, num_actions)
    bo_f = (ba @ wo_bot + bo).astype(jnp.float32)        # (1, num_actions)
    return w12, b12, wo_top, wao, bo_f


# ----------------------------------------------------------------------------
# Wrapper: batch-blocked grid, no pad/slice, VMEM-resident folded weights.
# ----------------------------------------------------------------------------
def qvalue_net_m(state, action, folded, *, tb=2048, input_dtype=None):
    """state: (B, state_dim), action: (B, action_param_dim) -> (B, num_actions)."""
    w12, b12, wo_top, wao, bo_f = folded

    B, state_dim = state.shape
    action_dim = action.shape[1]
    num_actions = wo_top.shape[1]

    if input_dtype is not None:
        state = state.astype(input_dtype)
        action = action.astype(input_dtype)

    # Batch tile selection:
    #  * large tiles amortize the fixed per-grid-step cost,
    #  * keep >= 2 grid steps when B allows so both v7x TensorCores get work,
    #  * multiple of 8 sublanes, never (much) beyond the batch itself.
    tb8 = _round_up(max(8, tb), 8)
    tb_eff = min(tb8,
                 _round_up(pl.cdiv(B, 2), 128),
                 _round_up(B, 8))
    tb_eff = max(8, tb_eff)
    grid = (pl.cdiv(B, tb_eff),)   # ragged last block handled by masked stores

    # VMEM budget: every batch-blocked stream lane-pads its feature axis to
    # 128 and is double-buffered; add the f32 x2 temporary and headroom.
    in_bytes = 2 if input_dtype == jnp.bfloat16 else 4
    stream_bytes = 2 * tb_eff * 128 * in_bytes * 2        # state + action
    out_bytes = tb_eff * 128 * 4 * 2                       # f32 output
    temp_bytes = tb_eff * 128 * 4                          # x2 temp
    est = 2 * (stream_bytes + out_bytes + temp_bytes) + (4 << 20)
    vmem_limit = int(min(64 << 20, max(16 << 20, est)))    # cap: v7x physical

    def resident(arr):
        # Full-array block, same block every grid step -> stays VMEM-resident.
        # (pipeline_mode=pl.Buffered(1) would single-buffer these, but the
        #  waste is only a few KiB and buffer_count=1 support varies across
        #  jax versions, so we keep the default.)
        return pl.BlockSpec(arr.shape, lambda i: (0, 0))

    out = pl.pallas_call(
        qvalue_kernel,
        out_shape=jax.ShapeDtypeStruct((B, num_actions), jnp.float32),
        grid=grid,
        in_specs=[
            pl.BlockSpec((tb_eff, state_dim), lambda i: (i, 0)),
            pl.BlockSpec((tb_eff, action_dim), lambda i: (i, 0)),
            resident(w12),
            resident(b12),
            resident(wo_top),
            resident(wao),
            resident(bo_f),
        ],
        out_specs=pl.BlockSpec((tb_eff, num_actions), lambda i: (i, 0)),
        compiler_params=pltpu.CompilerParams(
            dimension_semantics=("parallel",),
            vmem_limit_bytes=vmem_limit),
    )(state, action, w12, b12, wo_top, wao, bo_f)

    return out


def make_qvalue_net_m(params, *, tb=2048, input_dtype=None):
    """Fold params once at init; return a jitted forward(state, action)."""
    weight_dtype = jnp.float32 if input_dtype is None else input_dtype
    folded = fold_params(params, weight_dtype=weight_dtype)

    @jax.jit
    def fwd(state, action):
        return qvalue_net_m(state, action, folded, tb=tb, input_dtype=input_dtype)

    return fwd


# ----------------------------------------------------------------------------
# Deterministic synthetic init + pure-JAX reference (unfolded, PyTorch order).
# ----------------------------------------------------------------------------
def init_params(key, state_dim, action_param_dim, num_actions):
    """PyTorch Linear default init (uniform +-1/sqrt(fan_in)); weights stored
    pre-transposed as (in, out)."""
    def linear(key, fan_in, fan_out):
        kw, kb = jax.random.split(key)
        bound = 1.0 / jnp.sqrt(fan_in)
        w = jax.random.uniform(kw, (fan_in, fan_out), jnp.float32, -bound, bound)
        b = jax.random.uniform(kb, (1, fan_out), jnp.float32, -bound, bound)
        return w, b

    k1, k2, k3, k4 = jax.random.split(key, 4)
    w1, b1 = linear(k1, state_dim, HIDDEN)            # fc1
    w2, b2 = linear(k2, HIDDEN, HIDDEN)               # fc2
    wa, ba = linear(k3, action_param_dim, HIDDEN)     # action_encoder
    wo, bo = linear(k4, 2 * HIDDEN, num_actions)      # fc_out
    return (w1, b1, w2, b2, wa, ba, wo, bo)


def reference_forward(state, action, params):
    """Pure-JAX reference following the PyTorch module exactly (unfolded)."""
    (w1, b1, w2, b2, wa, ba, wo, bo) = params
    x1 = state @ w1 + b1
    x2 = jnp.maximum(x1 @ w2 + b2, 0.0)
    action_enc = action @ wa + ba
    state_ = jnp.concatenate([x2, action_enc], axis=1)
    return state_ @ wo + bo


if __name__ == "__main__":
    state_dim = 16
    action_param_dim = 8
    num_actions = 4

    key = jax.random.PRNGKey(0)
    kp, ks, ka = jax.random.split(key, 3)
    params = init_params(kp, state_dim, action_param_dim, num_actions)

    fwd = make_qvalue_net_m(params)   # f32 path; params folded once here

    # --- small batch: single grid step ---
    B = 8
    state = jax.random.normal(ks, (B, state_dim), jnp.float32)
    action = jax.random.normal(ka, (B, action_param_dim), jnp.float32)
    out = jax.block_until_ready(fwd(state, action))
    ref = reference_forward(state, action, params)
    assert out.shape == (B, num_actions)
    # Weight folding is exact algebra; only fp32 rounding order differs.
    assert jnp.allclose(out, ref, atol=1e-4, rtol=1e-4), "mismatch vs reference (B=8)"

    # --- larger batch: multi-step grid with ragged boundary block (no pad) ---
    B2 = 300
    ks2, ka2 = jax.random.split(jax.random.PRNGKey(1))
    state2 = jax.random.normal(ks2, (B2, state_dim), jnp.float32)
    action2 = jax.random.normal(ka2, (B2, action_param_dim), jnp.float32)
    out2 = jax.block_until_ready(fwd(state2, action2))
    ref2 = reference_forward(state2, action2, params)
    assert out2.shape == (B2, num_actions)
    assert jnp.allclose(out2, ref2, atol=1e-4, rtol=1e-4), "mismatch vs reference (B=300)"

    # --- optional bf16-input path (bandwidth win on v5e/v6e), looser parity ---
    fwd_bf16 = make_qvalue_net_m(params, input_dtype=jnp.bfloat16)
    out3 = jax.block_until_ready(fwd_bf16(state2, action2))
    assert out3.shape == (B2, num_actions)
    assert jnp.allclose(out3, ref2, atol=5e-2, rtol=5e-2), "mismatch vs reference (bf16)"

    print("KERNEL_OK")
</pallas_src>

<mosaic_0001>
module attributes {stable_mosaic.version = 11 : i64} {
  func.func @qvalue_kernel(%arg0: i32, %arg1: memref<8x16xf32, #tpu.memory_space<vmem>>, %arg2: memref<8x8xf32, #tpu.memory_space<vmem>>, %arg3: memref<16x64xf32, #tpu.memory_space<vmem>>, %arg4: memref<1x64xf32, #tpu.memory_space<vmem>>, %arg5: memref<64x4xf32, #tpu.memory_space<vmem>>, %arg6: memref<8x4xf32, #tpu.memory_space<vmem>>, %arg7: memref<1x4xf32, #tpu.memory_space<vmem>>, %arg8: memref<8x4xf32, #tpu.memory_space<vmem>>) attributes {dimension_semantics = [#tpu.dimension_semantics<parallel>], iteration_bounds = array<i64: 1>, scalar_prefetch = 0 : i64, scratch_operands = 0 : i64, tpu.core_type = #tpu.core_type<tc>, window_params = [{transform_indices = @transform_0, window_bounds = array<i64: 8, 16>}, {transform_indices = @transform_1, window_bounds = array<i64: 8, 8>}, {pipeline_mode = #tpu.pipeline_mode<synchronous>, transform_indices = @transform_2, window_bounds = array<i64: 16, 64>}, {pipeline_mode = #tpu.pipeline_mode<synchronous>, transform_indices = @transform_3, window_bounds = array<i64: 1, 64>}, {pipeline_mode = #tpu.pipeline_mode<synchronous>, transform_indices = @transform_4, window_bounds = array<i64: 64, 4>}, {pipeline_mode = #tpu.pipeline_mode<synchronous>, transform_indices = @transform_5, window_bounds = array<i64: 8, 4>}, {pipeline_mode = #tpu.pipeline_mode<synchronous>, transform_indices = @transform_6, window_bounds = array<i64: 1, 4>}, {transform_indices = @transform_7, window_bounds = array<i64: 8, 4>}]} {
    %c0 = arith.constant 0 : index
    %c0_0 = arith.constant 0 : index
    %0 = vector.load %arg4[%c0, %c0_0] : memref<1x64xf32, #tpu.memory_space<vmem>>, vector<1x64xf32>
    %c0_1 = arith.constant 0 : index
    %c0_2 = arith.constant 0 : index
    %1 = vector.load %arg7[%c0_1, %c0_2] : memref<1x4xf32, #tpu.memory_space<vmem>>, vector<1x4xf32>
    %c0_3 = arith.constant 0 : index
    %c0_4 = arith.constant 0 : index
    %2 = vector.load %arg1[%c0_3, %c0_4] : memref<8x16xf32, #tpu.memory_space<vmem>>, vector<8x16xf32>
    %c0_5 = arith.constant 0 : index
    %c0_6 = arith.constant 0 : index
    %3 = vector.load %arg3[%c0_5, %c0_6] : memref<16x64xf32, #tpu.memory_space<vmem>>, vector<16x64xf32>
    %cst = arith.constant dense<0.000000e+00> : vector<8x64xf32>
    %4 = tpu.matmul %2, %3, %cst {dimension_numbers = #tpu.dot_dimension_numbers<[1], [0], [0], [1], [0, 0, 1, 1], [], []>} : vector<8x16xf32>, vector<16x64xf32>, vector<8x64xf32> -> vector<8x64xf32>
    %5 = vector.broadcast %0 : vector<1x64xf32> to vector<8x64xf32>
    %6 = arith.addf %4, %5 : vector<8x64xf32>
    %cst_7 = arith.constant 0.000000e+00 : f32
    %7 = vector.broadcast %cst_7 : f32 to vector<8x64xf32>
    %8 = arith.maximumf %6, %7 : vector<8x64xf32>
    %c0_8 = arith.constant 0 : index
    %c0_9 = arith.constant 0 : index
    %9 = vector.load %arg5[%c0_8, %c0_9] : memref<64x4xf32, #tpu.memory_space<vmem>>, vector<64x4xf32>
    %cst_10 = arith.constant dense<0.000000e+00> : vector<8x4xf32>
    %10 = tpu.matmul %8, %9, %cst_10 {dimension_numbers = #tpu.dot_dimension_numbers<[1], [0], [0], [1], [0, 0, 1, 1], [], []>} : vector<8x64xf32>, vector<64x4xf32>, vector<8x4xf32> -> vector<8x4xf32>
    %c0_11 = arith.constant 0 : index
    %c0_12 = arith.constant 0 : index
    %11 = vector.load %arg2[%c0_11, %c0_12] : memref<8x8xf32, #tpu.memory_space<vmem>>, vector<8x8xf32>
    %c0_13 = arith.constant 0 : index
    %c0_14 = arith.constant 0 : index
    %12 = vector.load %arg6[%c0_13, %c0_14] : memref<8x4xf32, #tpu.memory_space<vmem>>, vector<8x4xf32>
    %cst_15 = arith.constant dense<0.000000e+00> : vector<8x4xf32>
    %13 = tpu.matmul %11, %12, %cst_15 {dimension_numbers = #tpu.dot_dimension_numbers<[1], [0], [0], [1], [0, 0, 1, 1], [], []>} : vector<8x8xf32>, vector<8x4xf32>, vector<8x4xf32> -> vector<8x4xf32>
    %14 = arith.addf %10, %13 : vector<8x4xf32>
    %15 = vector.broadcast %1 : vector<1x4xf32> to vector<8x4xf32>
    %16 = arith.addf %14, %15 : vector<8x4xf32>
    %c0_16 = arith.constant 0 : index
    %c0_17 = arith.constant 0 : index
    %17 = vector.load %arg8[%c0_16, %c0_17] : memref<8x4xf32, #tpu.memory_space<vmem>>, vector<8x4xf32>
    tpu.vector_store %arg8[%c0_16, %c0_17], %16 {strides = array<i32>} : memref<8x4xf32, #tpu.memory_space<vmem>>, vector<8x4xf32>,
    return
  }
  func.func @transform_0(%arg0: i32) -> (i32, i32) {
    %c0_i32 = arith.constant 0 : i32
    %c0_i32_0 = arith.constant 0 : i32
    return %arg0, %c0_i32 : i32, i32
  }
  func.func @transform_1(%arg0: i32) -> (i32, i32) {
    %c0_i32 = arith.constant 0 : i32
    %c0_i32_0 = arith.constant 0 : i32
    return %arg0, %c0_i32 : i32, i32
  }
  func.func @transform_2(%arg0: i32) -> (i32, i32) {
    %c0_i32 = arith.constant 0 : i32
    %c0_i32_0 = arith.constant 0 : i32
    %c0_i32_1 = arith.constant 0 : i32
    return %c0_i32, %c0_i32_0 : i32, i32
  }
  func.func @transform_3(%arg0: i32) -> (i32, i32) {
    %c0_i32 = arith.constant 0 : i32
    %c0_i32_0 = arith.constant 0 : i32
    %c0_i32_1 = arith.constant 0 : i32
    return %c0_i32, %c0_i32_0 : i32, i32
  }
  func.func @transform_4(%arg0: i32) -> (i32, i32) {
    %c0_i32 = arith.constant 0 : i32
    %c0_i32_0 = arith.constant 0 : i32
    %c0_i32_1 = arith.constant 0 : i32
    return %c0_i32, %c0_i32_0 : i32, i32
  }
  func.func @transform_5(%arg0: i32) -> (i32, i32) {
    %c0_i32 = arith.constant 0 : i32
    %c0_i32_0 = arith.constant 0 : i32
    %c0_i32_1 = arith.constant 0 : i32
    return %c0_i32, %c0_i32_0 : i32, i32
  }
  func.func @transform_6(%arg0: i32) -> (i32, i32) {
    %c0_i32 = arith.constant 0 : i32
    %c0_i32_0 = arith.constant 0 : i32
    %c0_i32_1 = arith.constant 0 : i32
    return %c0_i32, %c0_i32_0 : i32, i32
  }
  func.func @transform_7(%arg0: i32) -> (i32, i32) {
    %c0_i32 = arith.constant 0 : i32
    %c0_i32_0 = arith.constant 0 : i32
    return %arg0, %c0_i32 : i32, i32
  }
}

</mosaic_0001>

<bundles_post_ra>
// kernel: fwd.1
= control target key start
LH: loop header
LB: loop body
LE: loop exit
PB: predicated region body
PF: predicated region fallthrough
CT: control target
= control target key end

     0   :  { %12 = vsyncpa [#allocation3], 0  ;;  %s617_s0 = inlined_call_operand.hbm [shape: f32[8,16], index: 0, kind: input, shape index: {}]   ;;  %s618_s1 = inlined_call_operand.hbm [shape: f32[8,8], index: 1, kind: input, shape index: {}]   ;;  %s619_s2 = inlined_call_operand.hbm [shape: f32[16,64], index: 2, kind: input, shape index: {}]   ;;  %s620_s3 = inlined_call_operand.vmem [shape: f32[1,64], index: 3, kind: input, shape index: {}]   ;;  %s621_s4 = inlined_call_operand.hbm [shape: f32[64,4], index: 4, kind: input, shape index: {}]   ;;  %s622_s5 = inlined_call_operand.vmem [shape: f32[8,4], index: 5, kind: input, shape index: {}]   ;;  %s623_s6 = inlined_call_operand.vmem [shape: f32[1,4], index: 6, kind: input, shape index: {}]   ;;  %s624_s7 = inlined_call_operand.vmem [shape: f32[8,4], index: 7, kind: output, shape index: {}]  }
   0x1   :  { %13 = vsyncpa [#allocation5], 0 }
   0x2   :  { %14 = vsyncpa [#allocation8], 0  ;;  %s505_s24 = smov [#allocation4]   ;;  %s506_s26 = smov [#allocation2]  }
   0x3   :  { %s31_s25 = sshll.u32 %s505_s24, 4  ;;  %s21_s27 = sshll.u32 %s506_s26, 4  ;;  %s32_s25 = int_to_ptr.vmem [resolvable:$true] %s31_s25  ;;  %s22_s27 = int_to_ptr.vmem [resolvable:$true] %s21_s27 }
   0x4   :  { %s411_s30 = scalar_lea.hbm %s618_s1, 128 }
   0x5   :  { %p412_p0 = scmp.ne.s32.totalorder %s618_s1, %s411_s30  ;;  %p415_p1 = scmp.lt.u32.totalorder %s411_s30, %s618_s1 }
   0x7   :  { %p417_p2 = pnand %p415_p1, %p412_p0 }
   0x9   :  { %420 = shalt.err (!%p417_p2)
}
   0xa   :  { %s421_s12 = scalar_lea.vmem %s32_s25, 128  ;;  %p426_p4 = scmp.lt.s32.totalorder %s32_s25, %s32_s25 }
   0xb   :  { %p422_p3 = scmp.ne.s32.totalorder %s32_s25, %s421_s12  ;;  %p427_p5 = scmp.lt.s32.totalorder %s421_s12, %s421_s12 }
   0xd   :  { %p428_p6 = por %p427_p5, %p426_p4 }
   0xf   :  { %p429_p7 = pnand %p428_p6, %p422_p3 }
  0x11   :  { %432 = shalt.err (!%p429_p7)
}
  0x12   :  { %34 = dma.hbm_to_vmem [thread:$0]  %s618_s1, 128, %s32_s25, [#allocation5]  }
  0x13   :  { %s433_s17 = scalar_lea.hbm %s617_s0, 128 }
  0x14   :  { %p434_p8 = scmp.ne.s32.totalorder %s617_s0, %s433_s17  ;;  %p437_p9 = scmp.lt.u32.totalorder %s433_s17, %s617_s0 }
  0x16   :  { %p439_p10 = pnand %p437_p9, %p434_p8 }
  0x18   :  { %442 = shalt.err (!%p439_p10)
}
  0x19   :  { %s443_s22 = scalar_lea.vmem %s22_s27, 128  ;;  %p448_p12 = scmp.lt.s32.totalorder %s22_s27, %s22_s27 }
  0x1a   :  { %p444_p11 = scmp.ne.s32.totalorder %s22_s27, %s443_s22  ;;  %p449_p13 = scmp.lt.s32.totalorder %s443_s22, %s443_s22 }
  0x1c   :  { %p450_p0 = por %p449_p13, %p448_p12 }
  0x1e   :  { %p451_p1 = pnand %p450_p0, %p444_p11 }
  0x20   :  { %454 = shalt.err (!%p451_p1)
}
  0x21   :  { %24 = dma.hbm_to_vmem [thread:$0]  %s617_s0, 128, %s22_s27, [#allocation3]  }
  0x22   :  { %s507_s24 = smov [#allocation6]   ;;  %s455_s29 = scalar_lea.hbm %s619_s2, 256 }
  0x23   :  { %s40_s25 = sshll.u32 %s507_s24, 4  ;;  %p456_p2 = scmp.ne.s32.totalorder %s619_s2, %s455_s29  ;;  %s41_s25 = int_to_ptr.vmem [resolvable:$true] %s40_s25 }
  0x24   :  { %p459_p3 = scmp.lt.u32.totalorder %s455_s29, %s619_s2 }
  0x26   :  { %p461_p4 = pnand %p459_p3, %p456_p2 }
  0x28   :  { %464 = shalt.err (!%p461_p4)
}
  0x29   :  { %s465_s11 = scalar_lea.vmem %s41_s25, 256  ;;  %p470_p6 = scmp.lt.s32.totalorder %s41_s25, %s41_s25 }
  0x2a   :  { %p466_p5 = scmp.ne.s32.totalorder %s41_s25, %s465_s11  ;;  %p471_p7 = scmp.lt.s32.totalorder %s465_s11, %s465_s11 }
  0x2c   :  { %p472_p8 = por %p471_p7, %p470_p6 }
  0x2e   :  { %p473_p9 = pnand %p472_p8, %p466_p5 }
  0x30   :  { %476 = shalt.err (!%p473_p9)
}
  0x31   :  { %s508_s0 = smov 128   ;;  %s509_s27 = smov 8  }
  0x32   :  { %46 = dma.hbm_to_vmem [thread:$0]  %s619_s2, 256, %s41_s25, [#allocation5], %s508_s0, %s508_s0, %s509_s27  }
  0x33   :  { %s510_s14 = smov [#allocation7]   ;;  %s477_s18 = scalar_lea.hbm %s621_s4, 1024 }
  0x34   :  { %s54_s15 = sshll.u32 %s510_s14, 4  ;;  %p478_p10 = scmp.ne.s32.totalorder %s621_s4, %s477_s18  ;;  %s55_s15 = int_to_ptr.vmem [resolvable:$true] %s54_s15 }
  0x35   :  { %p481_p11 = scmp.lt.u32.totalorder %s477_s18, %s621_s4 }
  0x37   :  { %p483_p12 = pnand %p481_p11, %p478_p10 }
  0x39   :  { %486 = shalt.err (!%p483_p12)
}
  0x3a   :  { %s487_s1 = scalar_lea.vmem %s55_s15, 1024  ;;  %p492_p0 = scmp.lt.s32.totalorder %s55_s15, %s55_s15 }
  0x3b   :  { %p488_p13 = scmp.ne.s32.totalorder %s55_s15, %s487_s1  ;;  %p493_p1 = scmp.lt.s32.totalorder %s487_s1, %s487_s1 }
  0x3d   :  { %p494_p2 = por %p493_p1, %p492_p0 }
  0x3f   :  { %p495_p3 = pnand %p494_p2, %p488_p13 }
  0x41   :  { %498 = shalt.err (!%p495_p3)
}
  0x42   :  { %60 = dma.hbm_to_vmem [thread:$0]  %s621_s4, 1024, %s55_s15, [#allocation8], %s508_s0, %s508_s0, %s509_s27  }
  0x43   :  { %499 = dma.done.wait [#allocation3], 128  }
  0x44   :  { %500 = vsyncadd [#allocation3], 4294967168 }
  0x45   :  { %501 = dma.done.wait [#allocation5], 384  }
  0x46   :  { %502 = vsyncadd [#allocation5], 4294966912 }
  0x47   :  { %503 = dma.done.wait [#allocation8], 1024  }
  0x48   :  { %504 = vsyncadd [#allocation8], 4294966272  ;;  %v511_v0 = vmov 0.0|0.0   ;;  %vm512_vm0 = vmmov 0   ;;  %v513_v1 = vmov 0.0   ;;  %v80_v2 = vld [vmem:[#allocation6] sm:$0xff] }
  0x49   :  { %387 = vmatprep.subr.bf16.mxu0 %v511_v0  ;;  %360 = vmatprep.mubr.msk.f32.mxu0 %vm512_vm0, %v513_v1  ;;  %v81_v3 = vld [vmem:[#allocation6 + $0x8] sm:$0xff]  ;;  %v163_v5 = vld [vmem:[#allocation7] sm:$0xff]  ;;  %v164_v6 = vld [vmem:[#allocation7 + $0x8] sm:$0xff]  ;;  %vm88_vm1 = vcmask 130048   ;;  %vm173_vm2 = vcmask 64512   ;;  %vm247_vm3 = vcmask 523264  }
  0x4a   :  { %390 = vmatprep.subr.bf16.mxu1 %v511_v0  ;;  %384 = vmatprep.mubr.msk.f32.mxu1 %vm512_vm0, %v513_v1  ;;  %v388_v4 = vpack.c.bf16 %v81_v3, %v80_v2  ;;  %v165_v7 = vld [vmem:[#allocation7 + $0x10] sm:$0xff]  ;;  %v391_v8 = vpack.c.bf16 %v164_v6, %v163_v5  ;;  %v166_v9 = vld [vmem:[#allocation7 + $0x18] sm:$0xff]  ;;  %v79_v10 = vld [vmem:[#allocation2] sm:$0xff]  ;;  %vm328_vm4 = vcmask 31744  }
  0x4b   :  { %v394_v11 = vpack.c.bf16 %v166_v9, %v165_v7  ;;  %v167_v12 = vld [vmem:[#allocation7 + $0x20] sm:$0xff]  ;;  %v168_v13 = vld [vmem:[#allocation7 + $0x28] sm:$0xff]  ;;  %v169_v15 = vld [vmem:[#allocation7 + $0x30] sm:$0xff] }
  0x4c   :  { %389 = vmatpush3.bf16.msra.mxu0 %v388_v4  ;;  %392 = vmatpush3.bf16.msra.mxu1 %v391_v8  ;;  %v397_v14 = vpack.c.bf16 %v168_v13, %v167_v12  ;;  %v170_v16 = vld [vmem:[#allocation7 + $0x38] sm:$0xff]  ;;  %v172_v18 = vld [vmem:[%s622_s5] sm:$0xff]  ;;  %v171_v19 = vld [vmem:[#allocation4] sm:$0xff] }
  0x4d   :  { %363 = vmatprep.subr.mxu0 %v513_v1  ;;  %393 = vmatprep.subr.bf16.mxu1 %v511_v0  ;;  %v400_v17 = vpack.c.bf16 %v170_v16, %v169_v15  ;;  %v337_v20 = vld [vmem:[%s620_s3] ss:$0 sm:$0xff] }
  0x4e   :  { %v341_v27 = vld [vmem:[%s623_s6] ss:$0 sm:$0xff] }
  0x4f   :  { %361 = vmatmul.mubr.msk.f32.vlgmr.msra.gmra.mrb[0].mxu0 %vm88_vm1, %v79_v10 }
  0x50   :  { %365 = vmatprep.mubr.msk.f32.mxu0 %vm512_vm0, %v513_v1  ;;  %395 = vmatpush3.bf16.msra.mxu1 %v394_v11 }
  0x51   :  { %396 = vmatprep.subr.bf16.mxu1 %v511_v0  ;;  %364 = vmatpush3.msra.mxu0 %v172_v18 }
  0x53   :  { %366 = vmatmul.mubr.msk.f32.vlgmr.msra.gmra.mrb[2].mxu0 %vm173_vm2, %v171_v19 }
  0x54   :  { %398 = vmatpush3.bf16.msra.mxu1 %v397_v14 }
  0x55   :  { %399 = vmatprep.subr.bf16.mxu1 %v511_v0 }
  0x58   :  { %401 = vmatpush3.bf16.msra.mxu1 %v400_v17 }
 0x122   :  { %v158_v21 = vpop.f32.mrb[0].mxu0 }
 0x123   :  { %v159_v22 = vadd.f32 %v337_v20, %v158_v21  ;;  %v362_v23 = vpop.f32.mrb[1].mxu0 }
 0x125   :  { %v162_v24 = vmax.f32 %v159_v22, 0.0 }
 0x126   :  { %v243_v25 = vpop.f32.mrb[2].mxu0 }
 0x127   :  { %385 = vmatmul.mubr.msk.f32.vlgmr.msra.gmra.mrb[0].mxu1 %vm247_vm3, %v162_v24  ;;  %v367_v26 = vpop.f32.mrb[3].mxu0 }
 0x1fa   :  { %v317_v28 = vpop.f32.mrb[0].mxu1 }
 0x1fb   :  { %v318_v29 = vadd.f32 %v317_v28, %v243_v25  ;;  %v386_v30 = vpop.f32.mrb[1].mxu1 }
 0x1fd   :  { %v327_v31 = vadd.f32 %v341_v27, %v318_v29 }
 0x1ff   :  { %329 = vst.msk [vmem:[%s624_s7] sm:$0xff] %vm328_vm4, %v327_v31 }
 0x200   :  { %334 = vsyncpa [#allocation3], 1 }
 0x201   :  { %335 = vsyncpa [#allocation5], 1 }
 0x202   :  { %336 = vsyncpa [#allocation8], 1 }

</bundles_post_ra>
